<compile_context>
chip_gen: v7x
topology: tpu7x:2x2x1
jax: 0.10.0
libtpu: 0.0.40
codegen_flags: <defaults>
</compile_context>

<pallas_src>
import functools

import jax
import jax.numpy as jnp
from jax.experimental import pallas as pl
from jax.experimental.pallas import tpu as pltpu


def _decoder_kernel(z_ref, w1_ref, b1_ref, w2_ref, b2_ref, w3_ref, b3_ref, o_ref):
    # fc1 + tanh : bf16 MXU matmul, f32 accumulate, f32 nonlinearity
    t = jnp.tanh(
        jnp.dot(
            z_ref[...].astype(jnp.bfloat16),
            w1_ref[...],
            preferred_element_type=jnp.float32,
        )
        + b1_ref[...]
    )
    # fc2 + tanh
    t = jnp.tanh(
        jnp.dot(
            t.astype(jnp.bfloat16),
            w2_ref[...],
            preferred_element_type=jnp.float32,
        )
        + b2_ref[...]
    )
    # fc3 + sigmoid
    logits = (
        jnp.dot(
            t.astype(jnp.bfloat16),
            w3_ref[...],
            preferred_element_type=jnp.float32,
        )
        + b3_ref[...]
    )
    # sigmoid(x) = 1 / (1 + exp(-x)); exp on EUP, divide via approx vrcp (EUP).
    e = jnp.exp(-logits)
    o_ref[...] = pl.reciprocal(1.0 + e, approx=True).astype(o_ref.dtype)


def _round_up(x, m):
    return ((x + m - 1) // m) * m


def _pick_block_b(B):
    """Largest multiple-of-8 divisor of B that is <= 512 (falls back to B).

    If that choice would leave a single grid step and B can be split, halve it
    so v7x's two TensorCores both get work (grid >= 2 with 'parallel' axis).
    """
    best = None
    for cand in range(min(B, 512), 0, -1):
        if B % cand == 0 and cand % 8 == 0:
            best = cand
            break
    if best is None:
        best = B
    if best == B and B > 8 and B % 16 == 0 and (B // 2) % 8 == 0:
        best = B // 2
    return best


def _vmem_bytes(block_b, Z, H, Xp):
    """Rough VMEM working-set estimate (bytes) for one grid step."""
    f32, bf16 = 4, 2
    io = 2 * block_b * Z * f32 + 2 * block_b * Xp * f32          # dbl-buffered z / out tiles
    w = 2 * (Z * H + H * H + H * Xp) * bf16                       # dbl-buffered bf16 weights
    b = 2 * (H + H + Xp) * f32                                    # dbl-buffered bias rows
    inter = 3 * block_b * max(H, Xp) * f32                        # in-kernel intermediates
    return io + w + b + inter


@functools.partial(jax.jit, static_argnames=("block_b",))
def decoder_forward(z, w1, b1, w2, b2, w3, b3, *, block_b=None):
    """Run the fused decoder MLP as one Pallas kernel.

    z : [B, Z] float32
    w1: [Z, H], b1: [1, H]
    w2: [H, H], b2: [1, H]
    w3: [H, X], b3: [1, X]
    returns p: [B, X] float32
    """
    B, Z = z.shape
    H = w1.shape[1]
    X = w3.shape[1]

    # --- weight preprocessing: bf16 cast + lane-dense output padding ---------
    Xp = _round_up(X, 128)
    w1b = w1.astype(jnp.bfloat16)
    w2b = w2.astype(jnp.bfloat16)
    w3b = jnp.pad(w3, ((0, 0), (0, Xp - X))).astype(jnp.bfloat16)
    b3p = jnp.pad(b3, ((0, 0), (0, Xp - X)))
    b1f = b1.astype(jnp.float32)
    b2f = b2.astype(jnp.float32)

    # --- batch tiling --------------------------------------------------------
    if block_b is None:
        block_b = _pick_block_b(B)
    assert B % block_b == 0
    assert block_b == B or block_b % 8 == 0

    # Shrink the tile until the working set fits comfortably (v7x: 64 MiB phys,
    # 32 MiB default scoped VMEM).
    cap = 24 << 20
    budget = _vmem_bytes(block_b, Z, H, Xp)
    while budget > cap and block_b % 16 == 0 and (block_b // 2) % 8 == 0:
        block_b //= 2
        budget = _vmem_bytes(block_b, Z, H, Xp)
    vmem_limit = min(max(int(budget * 1.5) + (1 << 20), 16 << 20), 48 << 20)

    grid = (B // block_b,)

    out = pl.pallas_call(
        _decoder_kernel,
        out_shape=jax.ShapeDtypeStruct((B, Xp), jnp.float32),
        grid_spec=pltpu.PrefetchScalarGridSpec(
            num_scalar_prefetch=0,
            grid=grid,
            in_specs=[
                # batch tile of the latent input
                pl.BlockSpec((block_b, Z), lambda i: (i, 0)),
                # parameters: full arrays, constant block index (resident)
                pl.BlockSpec((Z, H), lambda i: (0, 0)),
                pl.BlockSpec((1, H), lambda i: (0, 0)),
                pl.BlockSpec((H, H), lambda i: (0, 0)),
                pl.BlockSpec((1, H), lambda i: (0, 0)),
                pl.BlockSpec((H, Xp), lambda i: (0, 0)),
                pl.BlockSpec((1, Xp), lambda i: (0, 0)),
            ],
            out_specs=pl.BlockSpec((block_b, Xp), lambda i: (i, 0)),
        ),
        compiler_params=pltpu.CompilerParams(
            dimension_semantics=("parallel",),
            vmem_limit_bytes=vmem_limit,
        ),
    )(z, w1b, b1f, w2b, b2f, w3b, b3p)

    # Slice away the lane-padding columns (they hold sigmoid(0)=0.5).
    return out[:, :X]


def init_decoder_params(key, z_size, hidden_size, x_size):
    """Deterministic synthetic init mirroring nn.Linear shapes.

    PyTorch stores weights as [out, in]; we keep them [in, out] for the kernel.
    """
    k1, k2, k3, k4, k5, k6 = jax.random.split(key, 6)
    scale = 0.1
    w1 = scale * jax.random.normal(k1, (z_size, hidden_size), jnp.float32)
    b1 = scale * jax.random.normal(k2, (1, hidden_size), jnp.float32)
    w2 = scale * jax.random.normal(k3, (hidden_size, hidden_size), jnp.float32)
    b2 = scale * jax.random.normal(k4, (1, hidden_size), jnp.float32)
    w3 = scale * jax.random.normal(k5, (hidden_size, x_size), jnp.float32)
    b3 = scale * jax.random.normal(k6, (1, x_size), jnp.float32)
    return w1, b1, w2, b2, w3, b3


def decoder_ref(z, w1, b1, w2, b2, w3, b3):
    t = jnp.tanh(z @ w1 + b1)
    t = jnp.tanh(t @ w2 + b2)
    return jax.nn.sigmoid(t @ w3 + b3)


if __name__ == "__main__":
    # Small shapes consistent with the module's forward pass.
    # (Production use should pass a large stacked batch; at tiny shapes the
    # call is dispatch-overhead bound regardless of kernel quality.)
    batch = 8
    z_size = 16
    hidden_size = 32
    x_size = 24

    key = jax.random.PRNGKey(0)
    kz, kp = jax.random.split(key)

    z = jax.random.normal(kz, (batch, z_size), jnp.float32)
    params = init_decoder_params(kp, z_size, hidden_size, x_size)

    p = decoder_forward(z, *params)
    p = jax.block_until_ready(p)

    # Correctness check against the pure-JAX f32 reference of the PyTorch
    # forward. Tolerance is relaxed because the kernel uses bf16 MXU operands
    # and an approximate (EUP) reciprocal in the sigmoid.
    p_ref = decoder_ref(z, *params)
    assert p.shape == (batch, x_size)
    assert jnp.allclose(p, p_ref, atol=2e-2, rtol=2e-2), (
        float(jnp.max(jnp.abs(p - p_ref)))
    )

    # Also exercise a larger, multi-grid-step batch path (tiling / megacore).
    big_b = 1024
    zb = jax.random.normal(jax.random.PRNGKey(1), (big_b, z_size), jnp.float32)
    pb = jax.block_until_ready(decoder_forward(zb, *params))
    pb_ref = decoder_ref(zb, *params)
    assert pb.shape == (big_b, x_size)
    assert jnp.allclose(pb, pb_ref, atol=2e-2, rtol=2e-2)

    print("KERNEL_OK")
</pallas_src>

<mosaic_0001>
module attributes {stable_mosaic.version = 11 : i64} {
  func.func @_decoder_kernel(%arg0: i32, %arg1: memref<8x16xf32, #tpu.memory_space<vmem>>, %arg2: memref<16x32xbf16, #tpu.memory_space<vmem>>, %arg3: memref<1x32xf32, #tpu.memory_space<vmem>>, %arg4: memref<32x32xbf16, #tpu.memory_space<vmem>>, %arg5: memref<1x32xf32, #tpu.memory_space<vmem>>, %arg6: memref<32x128xbf16, #tpu.memory_space<vmem>>, %arg7: memref<1x128xf32, #tpu.memory_space<vmem>>, %arg8: memref<8x128xf32, #tpu.memory_space<vmem>>) attributes {dimension_semantics = [#tpu.dimension_semantics<parallel>], iteration_bounds = array<i64: 1>, scalar_prefetch = 0 : i64, scratch_operands = 0 : i64, tpu.core_type = #tpu.core_type<tc>, window_params = [{transform_indices = @transform_0, window_bounds = array<i64: 8, 16>}, {pipeline_mode = #tpu.pipeline_mode<synchronous>, transform_indices = @transform_1, window_bounds = array<i64: 16, 32>}, {pipeline_mode = #tpu.pipeline_mode<synchronous>, transform_indices = @transform_2, window_bounds = array<i64: 1, 32>}, {pipeline_mode = #tpu.pipeline_mode<synchronous>, transform_indices = @transform_3, window_bounds = array<i64: 32, 32>}, {pipeline_mode = #tpu.pipeline_mode<synchronous>, transform_indices = @transform_4, window_bounds = array<i64: 1, 32>}, {pipeline_mode = #tpu.pipeline_mode<synchronous>, transform_indices = @transform_5, window_bounds = array<i64: 32, 128>}, {pipeline_mode = #tpu.pipeline_mode<synchronous>, transform_indices = @transform_6, window_bounds = array<i64: 1, 128>}, {transform_indices = @transform_7, window_bounds = array<i64: 8, 128>}]} {
    %c0 = arith.constant 0 : index
    %c0_0 = arith.constant 0 : index
    %0 = vector.load %arg1[%c0, %c0_0] : memref<8x16xf32, #tpu.memory_space<vmem>>, vector<8x16xf32>
    %1 = arith.truncf %0 : vector<8x16xf32> to vector<8x16xbf16>
    %c0_1 = arith.constant 0 : index
    %c0_2 = arith.constant 0 : index
    %2 = vector.load %arg2[%c0_1, %c0_2] : memref<16x32xbf16, #tpu.memory_space<vmem>>, vector<16x32xbf16>
    %cst = arith.constant dense<0.000000e+00> : vector<8x32xf32>
    %3 = tpu.matmul %1, %2, %cst {dimension_numbers = #tpu.dot_dimension_numbers<[1], [0], [0], [1], [0, 0, 1, 1], [], []>} : vector<8x16xbf16>, vector<16x32xbf16>, vector<8x32xf32> -> vector<8x32xf32>
    %c0_3 = arith.constant 0 : index
    %c0_4 = arith.constant 0 : index
    %4 = vector.load %arg3[%c0_3, %c0_4] : memref<1x32xf32, #tpu.memory_space<vmem>>, vector<1x32xf32>
    %5 = vector.broadcast %4 : vector<1x32xf32> to vector<8x32xf32>
    %6 = arith.addf %3, %5 : vector<8x32xf32>
    %7 = math.tanh %6 : vector<8x32xf32>
    %8 = arith.truncf %7 : vector<8x32xf32> to vector<8x32xbf16>
    %c0_5 = arith.constant 0 : index
    %c0_6 = arith.constant 0 : index
    %9 = vector.load %arg4[%c0_5, %c0_6] : memref<32x32xbf16, #tpu.memory_space<vmem>>, vector<32x32xbf16>
    %cst_7 = arith.constant dense<0.000000e+00> : vector<8x32xf32>
    %10 = tpu.matmul %8, %9, %cst_7 {dimension_numbers = #tpu.dot_dimension_numbers<[1], [0], [0], [1], [0, 0, 1, 1], [], []>} : vector<8x32xbf16>, vector<32x32xbf16>, vector<8x32xf32> -> vector<8x32xf32>
    %c0_8 = arith.constant 0 : index
    %c0_9 = arith.constant 0 : index
    %11 = vector.load %arg5[%c0_8, %c0_9] : memref<1x32xf32, #tpu.memory_space<vmem>>, vector<1x32xf32>
    %12 = vector.broadcast %11 : vector<1x32xf32> to vector<8x32xf32>
    %13 = arith.addf %10, %12 : vector<8x32xf32>
    %14 = math.tanh %13 : vector<8x32xf32>
    %15 = arith.truncf %14 : vector<8x32xf32> to vector<8x32xbf16>
    %c0_10 = arith.constant 0 : index
    %c0_11 = arith.constant 0 : index
    %16 = vector.load %arg6[%c0_10, %c0_11] : memref<32x128xbf16, #tpu.memory_space<vmem>>, vector<32x128xbf16>
    %cst_12 = arith.constant dense<0.000000e+00> : vector<8x128xf32>
    %17 = tpu.matmul %15, %16, %cst_12 {dimension_numbers = #tpu.dot_dimension_numbers<[1], [0], [0], [1], [0, 0, 1, 1], [], []>} : vector<8x32xbf16>, vector<32x128xbf16>, vector<8x128xf32> -> vector<8x128xf32>
    %c0_13 = arith.constant 0 : index
    %c0_14 = arith.constant 0 : index
    %18 = vector.load %arg7[%c0_13, %c0_14] : memref<1x128xf32, #tpu.memory_space<vmem>>, vector<1x128xf32>
    %19 = vector.broadcast %18 : vector<1x128xf32> to vector<8x128xf32>
    %20 = arith.addf %17, %19 : vector<8x128xf32>
    %cst_15 = arith.constant 0.000000e+00 : f32
    %21 = vector.broadcast %cst_15 : f32 to vector<8x128xf32>
    %22 = arith.subf %21, %20 : vector<8x128xf32>
    %23 = math.exp %22 : vector<8x128xf32>
    %cst_16 = arith.constant 1.000000e+00 : f32
    %24 = vector.broadcast %cst_16 : f32 to vector<8x128xf32>
    %25 = arith.addf %24, %23 : vector<8x128xf32>
    %26 = tpu.reciprocal %25 {approx = true} : vector<8x128xf32> -> vector<8x128xf32>
    %c0_17 = arith.constant 0 : index
    %c0_18 = arith.constant 0 : index
    %27 = vector.load %arg8[%c0_17, %c0_18] : memref<8x128xf32, #tpu.memory_space<vmem>>, vector<8x128xf32>
    tpu.vector_store %arg8[%c0_17, %c0_18], %26 {strides = array<i32>} : memref<8x128xf32, #tpu.memory_space<vmem>>, vector<8x128xf32>,
    return
  }
  func.func @transform_0(%arg0: i32) -> (i32, i32) {
    %c0_i32 = arith.constant 0 : i32
    %c0_i32_0 = arith.constant 0 : i32
    return %arg0, %c0_i32 : i32, i32
  }
  func.func @transform_1(%arg0: i32) -> (i32, i32) {
    %c0_i32 = arith.constant 0 : i32
    %c0_i32_0 = arith.constant 0 : i32
    %c0_i32_1 = arith.constant 0 : i32
    return %c0_i32, %c0_i32_0 : i32, i32
  }
  func.func @transform_2(%arg0: i32) -> (i32, i32) {
    %c0_i32 = arith.constant 0 : i32
    %c0_i32_0 = arith.constant 0 : i32
    %c0_i32_1 = arith.constant 0 : i32
    return %c0_i32, %c0_i32_0 : i32, i32
  }
  func.func @transform_3(%arg0: i32) -> (i32, i32) {
    %c0_i32 = arith.constant 0 : i32
    %c0_i32_0 = arith.constant 0 : i32
    %c0_i32_1 = arith.constant 0 : i32
    return %c0_i32, %c0_i32_0 : i32, i32
  }
  func.func @transform_4(%arg0: i32) -> (i32, i32) {
    %c0_i32 = arith.constant 0 : i32
    %c0_i32_0 = arith.constant 0 : i32
    %c0_i32_1 = arith.constant 0 : i32
    return %c0_i32, %c0_i32_0 : i32, i32
  }
  func.func @transform_5(%arg0: i32) -> (i32, i32) {
    %c0_i32 = arith.constant 0 : i32
    %c0_i32_0 = arith.constant 0 : i32
    %c0_i32_1 = arith.constant 0 : i32
    return %c0_i32, %c0_i32_0 : i32, i32
  }
  func.func @transform_6(%arg0: i32) -> (i32, i32) {
    %c0_i32 = arith.constant 0 : i32
    %c0_i32_0 = arith.constant 0 : i32
    %c0_i32_1 = arith.constant 0 : i32
    return %c0_i32, %c0_i32_0 : i32, i32
  }
  func.func @transform_7(%arg0: i32) -> (i32, i32) {
    %c0_i32 = arith.constant 0 : i32
    %c0_i32_0 = arith.constant 0 : i32
    return %arg0, %c0_i32 : i32, i32
  }
}

</mosaic_0001>

<bundles_post_ra>
// kernel: decoder_forward.1
= control target key start
LH: loop header
LB: loop body
LE: loop exit
PB: predicated region body
PF: predicated region fallthrough
CT: control target
= control target key end

     0   :  { %v327_v1 = vmov 0.0   ;;  %vm45_vm0 = vcmask 130048   ;;  %vm328_vm1 = vmmov 0   ;;  %s411_s0 = inlined_call_operand.vmem [shape: f32[8,16], index: 0, kind: input, shape index: {}]   ;;  %s412_s1 = inlined_call_operand.vmem [shape: bf16[16,32], index: 1, kind: input, shape index: {}]   ;;  %s413_s2 = inlined_call_operand.vmem [shape: f32[1,32], index: 2, kind: input, shape index: {}]   ;;  %s414_s3 = inlined_call_operand.vmem [shape: bf16[32,32], index: 3, kind: input, shape index: {}]   ;;  %s415_s4 = inlined_call_operand.vmem [shape: f32[1,32], index: 4, kind: input, shape index: {}]   ;;  %s416_s5 = inlined_call_operand.vmem [shape: bf16[32,128], index: 5, kind: input, shape index: {}]   ;;  %s417_s6 = inlined_call_operand.vmem [shape: f32[1,128], index: 6, kind: input, shape index: {}]   ;;  %s418_s7 = inlined_call_operand.hbm [shape: f32[8,128], index: 7, kind: output, shape index: {}]  }
   0x1   :  { %v290_v0 = vld [vmem:[%s412_s1] sm:$0xff]   ;;  %265 = vmatprep.subr.bf16.mxu0 %v327_v1  ;;  %271 = vmatprep.subr.bf16.mxu1 %v327_v1 }
   0x2   :  { %v28_v2 = vld [vmem:[%s411_s0] sm:$0xff]  ;;  %266 = vmatpush3.bf16.msra.mxu0 %v290_v0  ;;  %267 = vmatprep.mubr.msk.bf16.mxu0 %vm328_vm1, %v327_v1 }
   0x3   :  { %v29_v3 = vpack.c.bf16 %v28_v2, %v28_v2  ;;  %275 = vmatprep.mubr.msk.bf16.mxu1 %vm328_vm1, %v327_v1  ;;  %279 = vmatprep.subr.bf16.mxu0 %v327_v1 }
   0x4   :  { %12 = vsyncpa [#allocation3], 0  ;;  %v291_v4 = vld [vmem:[%s414_s3] sm:$0xff]   ;;  %v292_v5 = vld [vmem:[%s414_s3 + $0x8] sm:$0xff]   ;;  %vm114_vm2 = vcmask 261120  }
   0x5   :  { %268 = vmatmul.mubr.msk.bf16.vlgmr.msra.gmra.mrb[0].mxu0 %vm45_vm0, %v29_v3  ;;  %272 = vmatpush3.bf16.msra.mxu1 %v291_v4  ;;  %v246_v6 = vld [vmem:[%s413_s2] ss:$0 sm:$0xff]  ;;  %v294_v15 = vld [vmem:[%s416_s5 + $0x8] sm:$0xff]  }
   0x6   :  { %283 = vmatprep.mubr.msk.bf16.mxu0 %vm328_vm1, %v327_v1  ;;  %273 = vmatprep.subr.bf16.mxu1 %v327_v1  ;;  %v293_v14 = vld [vmem:[%s416_s5] sm:$0xff]  }
   0x7   :  { %280 = vmatpush3.bf16.msra.mxu0 %v293_v14  ;;  %v249_v16 = vld [vmem:[%s415_s4] ss:$0 sm:$0xff]  ;;  %s329_s4 = smov [#allocation2]  }
   0x8   :  { %281 = vmatprep.subr.bf16.mxu0 %v327_v1  ;;  %v253_v24 = vld [vmem:[%s417_s6] ss:$0 sm:$0xff]  ;;  %s238_s5 = sshll.u32 %s329_s4, 4  ;;  %s239_s5 = int_to_ptr.vmem [resolvable:$true] %s238_s5 }
   0x9   :  { %274 = vmatpush3.bf16.msra.mxu1 %v292_v5  ;;  %s303_s15 = scalar_lea.vmem %s239_s5, 128  ;;  %p308_p1 = scmp.lt.s32.totalorder %s239_s5, %s239_s5 }
   0xa   :  { %p304_p0 = scmp.ne.s32.totalorder %s239_s5, %s303_s15  ;;  %p309_p2 = scmp.lt.s32.totalorder %s303_s15, %s303_s15 }
   0xb   :  { %282 = vmatpush3.bf16.msra.mxu0 %v294_v15 }
   0xc   :  { %p310_p3 = por %p309_p2, %p308_p1 }
   0xe   :  { %p311_p4 = pnand %p310_p3, %p304_p0 }
  0xd8   :  { %v83_v7 = vpop.f32.mrb[0].mxu0 }
  0xd9   :  { %v84_v8 = vadd.f32 %v246_v6, %v83_v7  ;;  %v269_v9 = vpop.f32.mrb[1].mxu0 }
  0xda   :  { %v86_v10 = vpop.f32.mrb[2].mxu0 }
  0xdb   :  { %295 = vtanh.f32 %v84_v8  ;;  %v270_v11 = vpop.f32.mrb[3].mxu0 }
  0xe5   :  { %v296_v12 = vpop.eup %295 }
  0xe6   :  { %v90_v13 = vpack.c.bf16 %v296_v12, %v296_v12 }
  0xe8   :  { %276 = vmatmul.mubr.msk.bf16.vlgmr.msra.gmra.mrb[0].mxu1 %vm114_vm2, %v90_v13 }
 0x1bb   :  { %v152_v17 = vpop.f32.mrb[0].mxu1 }
 0x1bc   :  { %v153_v18 = vadd.f32 %v249_v16, %v152_v17  ;;  %v277_v19 = vpop.f32.mrb[1].mxu1 }
 0x1bd   :  { %v155_v20 = vpop.f32.mrb[2].mxu1 }
 0x1be   :  { %297 = vtanh.f32 %v153_v18  ;;  %v278_v21 = vpop.f32.mrb[3].mxu1 }
 0x1c8   :  { %v298_v22 = vpop.eup %297 }
 0x1c9   :  { %v159_v23 = vpack.c.bf16 %v298_v22, %v298_v22 }
 0x1cb   :  { %284 = vmatmul.mubr.msk.bf16.vlgmr.msra.gmra.mrb[4].mxu0 %vm114_vm2, %v159_v23 }
 0x29e   :  { %v220_v25 = vpop.f32.mrb[4].mxu0 }
 0x29f   :  { %v221_v26 = vadd.f32 %v253_v24, %v220_v25  ;;  %v285_v27 = vpop.f32.mrb[5].mxu0 }
 0x2a0   :  { %v223_v28 = vpop.f32.mrb[6].mxu0 }
 0x2a1   :  { %v226_v29 = vsub.f32 0.0, %v221_v26  ;;  %v286_v30 = vpop.f32.mrb[7].mxu0 }
 0x2a3   :  { %v227_v31 = vmul.f32 1.442695, %v226_v29 }
 0x2a5   :  { %299 = vpow2.f32 %v227_v31 }
 0x2af   :  { %v300_v32 = vpop.eup %299 }
 0x2b0   :  { %v229_v33 = vadd.f32 1.0, %v300_v32 }
 0x2b2   :  { %301 = vrcp.f32 %v229_v33 }
 0x2bc   :  { %v302_v34 = vpop.eup %301 }
 0x2bd   :  { %231 = vst [vmem:[#allocation2] sm:$0xff] %v302_v34 }
 0x2be   :  { %314 = shalt.err (!%p311_p4)
}
 0x2bf   :  { %s315_s17 = scalar_lea.hbm %s418_s7, 128 }
 0x2c0   :  { %p316_p5 = scmp.ne.s32.totalorder %s418_s7, %s315_s17  ;;  %p319_p6 = scmp.lt.u32.totalorder %s315_s17, %s418_s7 }
 0x2c2   :  { %p321_p7 = pnand %p319_p6, %p316_p5 }
 0x2c4   :  { %324 = shalt.err (!%p321_p7)
}
 0x2c5   :  { %241 = dma.vmem_to_hbm [thread:$0]  %s239_s5, 128, %s418_s7, [#allocation3]  }
 0x2c6   :  { %325 = dma.done.wait [#allocation3], 128  }
 0x2c7   :  { %326 = vsyncadd [#allocation3], 4294967168 }
 0x2c8   :  { %245 = vsyncpa [#allocation3], 1 }

</bundles_post_ra>
